<compile_context>
chip_gen: v7x
topology: tpu7x:2x2x1
jax: 0.10.0
libtpu: 0.0.40
codegen_flags: <defaults>
</compile_context>

<pallas_src>
import jax
import jax.numpy as jnp
from jax.experimental import pallas as pl
from jax.experimental.pallas import tpu as pltpu

EPS = 1e-7
ONE_EPS = 1.0 + EPS
LANES = 128
PRED_PAD = -1e4          # sigmoid/tanh saturate to exactly 0 for padded logits


def _round_up(x, m):
    return ((x + m - 1) // m) * m


def _acw_reduce_kernel(pred_ref, target_ref, mask_ref, acc_ref):
    # acc_ref block: (1, 4, C, 128) resident per-(partial, n) accumulator.
    #   row 0: A  = sum target*mask
    #   row 1: B  = sum p*target*mask          (dice numerator / 2)
    #   row 2: PM = sum p*mask                 (union = A + PM in the epilogue)
    #   row 3: S  = sum (1 + p + target)*pnc   (ACW-weighted pnc, unmasked)
    @pl.when(pl.program_id(2) == 0)
    def _():
        acc_ref[...] = jnp.zeros_like(acc_ref)

    x = pred_ref[0].astype(jnp.float32)           # (C, TS, 128) logits
    t = target_ref[0].astype(jnp.float32)         # (C, TS, 128)
    m = mask_ref[0].astype(jnp.float32)[None]     # (1, TS, 128)

    # 1-op EUP sigmoid: p = 0.5*(tanh(x/2)+1).  tanh(-5e3) == -1 exactly, so
    # the -1e4 pad sentinel still yields p == 0 exactly.
    p = 0.5 * (jnp.tanh(0.5 * x) + 1.0)

    tm = t * m
    pm = p * m
    d = t - p
    err = d * d
    # log((1-err+eps)/(1+err+eps)) == log((1+eps)-err) - log((1+eps)+err):
    # EPS constant-folded, no full-precision divide on the EUP path.
    pnc = err - jnp.log(ONE_EPS - err) + jnp.log(ONE_EPS + err)
    s_term = (1.0 + (p + t)) * pnc

    # Reduce only over the sublane-row axis; lanes stay dense in the resident
    # accumulator, the cheap cross-lane reduce happens once in the epilogue.
    acc_ref[0, 0] += jnp.sum(tm, axis=1)          # A   (C, 128)
    acc_ref[0, 1] += jnp.sum(p * tm, axis=1)      # B
    acc_ref[0, 2] += jnp.sum(pm, axis=1)          # PM
    acc_ref[0, 3] += jnp.sum(s_term, axis=1)      # S


def mla_cw_loss(pred, target, mask, *, input_budget_bytes=8 * 1024 * 1024):
    """MLACWLoss forward (first call of the stateful PyTorch module).

    pred (logits), target: (N, C, H, W); mask: (N, H, W). Returns scalar loss.
    Narrow dtypes (bf16 pred/target, int8/uint8 target/mask) are supported —
    the kernel upcasts internally; produce them upstream, do not downcast here.
    """
    N, C, H, W = pred.shape
    HW = H * W
    p_item = jnp.dtype(pred.dtype).itemsize
    t_item = jnp.dtype(target.dtype).itemsize
    m_item = jnp.dtype(mask.dtype).itemsize

    S0 = pl.cdiv(HW, LANES)                     # spatial rows of 128 lanes

    # ---- 2 partials whenever there is enough work -> both v7x TCs busy ----
    P = 2 if S0 >= 16 else 1

    # ---- tile sizing: double-buffered pred + target + mask blocks ----
    input_budget_bytes = min(max(input_budget_bytes, 64 * 1024), 20 * 1024 * 1024)
    row_bytes = C * LANES * (p_item + t_item) + LANES * m_item
    budget_rows = max(8, (input_budget_bytes // (2 * row_bytes)) // 8 * 8)

    if P == 1 and S0 <= budget_rows:
        # Single block spans the whole row axis: block dim == full dim, so no
        # multiple-of-8 rounding and no row padding at all.
        TS, NT, S_pad = S0, 1, S0
    else:
        # Balanced tiles: NT tiles of TS rows per partial; row padding is at
        # most ~8*P*NT rows (vs. the old round-to-P*TS scheme).
        NT = max(1, pl.cdiv(S0, P * budget_rows))
        TS = _round_up(pl.cdiv(S0, P * NT), 8)
        S_pad = P * NT * TS

    # ---- flatten spatial; pad only if lane/row alignment demands it ----
    HW_pad = S_pad * LANES
    pred2 = pred.reshape(N, C, HW)
    target2 = target.reshape(N, C, HW)
    mask2 = mask.reshape(N, HW)
    if HW_pad != HW:
        pad = HW_pad - HW
        # pred pad = large negative logit -> p == 0 exactly (tanh form too);
        # with target = mask = 0 every padded element contributes EXACTLY zero
        # to all four accumulators, so no in-kernel masking is needed.
        pred2 = jnp.pad(pred2, ((0, 0), (0, 0), (0, pad)),
                        constant_values=PRED_PAD)
        target2 = jnp.pad(target2, ((0, 0), (0, 0), (0, pad)))
        mask2 = jnp.pad(mask2, ((0, 0), (0, pad)))
    pred4 = pred2.reshape(N, C, S_pad, LANES)
    target4 = target2.reshape(N, C, S_pad, LANES)
    mask3 = mask2.reshape(N, S_pad, LANES)

    grid_spec = pltpu.PrefetchScalarGridSpec(
        num_scalar_prefetch=0,
        grid=(P, N, NT),
        in_specs=[
            pl.BlockSpec((1, C, TS, LANES), lambda p, n, s: (n, 0, p * NT + s, 0)),
            pl.BlockSpec((1, C, TS, LANES), lambda p, n, s: (n, 0, p * NT + s, 0)),
            pl.BlockSpec((1, TS, LANES), lambda p, n, s: (n, p * NT + s, 0)),
        ],
        # Partial accumulator per (p, n), flattened to a leading P*N axis so
        # both the P and N grid axes can be marked "parallel" (v7x megacore).
        out_specs=pl.BlockSpec((1, 4, C, LANES),
                               lambda p, n, s: (p * N + n, 0, 0, 0)),
    )

    # ---- VMEM limit derived from the actual footprint (incl. mask) ----
    in_block_bytes = C * TS * LANES * (p_item + t_item) + TS * LANES * m_item
    out_block_bytes = 4 * C * LANES * 4
    footprint = 2 * in_block_bytes + 2 * out_block_bytes
    vmem_limit = int(min(max(footprint + 8 * 2**20, 16 * 2**20), 30 * 2**20))

    elems = N * C * HW_pad
    cost = pl.CostEstimate(
        flops=14 * elems,
        transcendentals=3 * elems,           # tanh + two logs per element
        bytes_accessed=N * C * HW_pad * (p_item + t_item)
        + N * HW_pad * m_item + P * N * 4 * C * LANES * 4,
    )

    acc = pl.pallas_call(
        _acw_reduce_kernel,
        out_shape=jax.ShapeDtypeStruct((P * N, 4, C, LANES), jnp.float32),
        grid_spec=grid_spec,
        compiler_params=pltpu.CompilerParams(
            dimension_semantics=("parallel", "parallel", "arbitrary"),
            vmem_limit_bytes=vmem_limit,
        ),
        cost_estimate=cost,
    )(pred4, target4, mask3)

    # ---- tiny O(C) epilogue in plain JAX ----
    sums = acc.sum(axis=(0, 3))                  # (4, C): partials + lanes
    a, b, pm_sum, s = sums[0], sums[1], sums[2], sums[3]
    u = a + pm_sum                               # union = sum (p + t) * mask

    # adaptive_class_weight, first call: self.weight == weight_curr
    w = a / (a.sum() + EPS)
    mfb = w.mean() / (w + EPS)
    mfb = mfb / (mfb.sum() + EPS)

    # loss_pnc.mean() == (1/(N*H*W)) * sum_c mfb[c] * S[c]
    loss_pnc_mean = jnp.sum(mfb * s) / (N * H * W)

    dice = (2.0 * b + EPS) / (u + EPS)
    return loss_pnc_mean - jnp.log(dice.mean())


def _ref_loss(pred, target, mask):
    """Pure-JAX reference mirroring the PyTorch forward (first call)."""
    p = jax.nn.sigmoid(pred)
    sum_class = jnp.sum(target * mask[:, None], axis=(0, 2, 3))
    w = sum_class / (sum_class.sum() + EPS)
    mfb = w.mean() / (w + EPS)
    mfb = mfb / (mfb.sum() + EPS)
    acw = (1.0 + p + target) * mfb[None, :, None, None]
    err = (target - p) ** 2
    pnc = err - jnp.log((1.0 - err + EPS) / (1.0 + err + EPS))
    loss_pnc = jnp.sum(acw * pnc, axis=1)
    inter = 2.0 * jnp.sum(p * target * mask[:, None], axis=(0, 2, 3)) + EPS
    union = jnp.sum((p + target) * mask[:, None], axis=(0, 2, 3)) + EPS
    dice = inter / union
    return loss_pnc.mean() - jnp.log(dice.mean())


def _make_inputs(key, N, C, H, W):
    k1, k2, k3 = jax.random.split(key, 3)
    pred = jax.random.normal(k1, (N, C, H, W), dtype=jnp.float32)            # logits
    target = (jax.random.uniform(k2, (N, C, H, W)) > 0.5).astype(jnp.float32)
    mask = (jax.random.uniform(k3, (N, H, W)) > 0.3).astype(jnp.float32)
    return pred, target, mask


if __name__ == "__main__":
    # --- primary small case: single full-extent block, P=1, NO padding ---
    N, C, H, W = 2, 4, 16, 16
    pred, target, mask = _make_inputs(jax.random.PRNGKey(0), N, C, H, W)
    loss = jax.block_until_ready(mla_cw_loss(pred, target, mask))
    ref = jax.block_until_ready(_ref_loss(pred, target, mask))
    assert jnp.isfinite(loss), "non-finite loss"
    assert jnp.allclose(loss, ref, rtol=1e-5, atol=1e-5), (loss, ref)

    # --- tiled + 2-partial (megacore) + ragged-HW path: forces P=2, NT=2,
    #     TS=8 and minimal spatial padding (50*50 = 2500 -> 32*128). ---
    N2, C2, H2, W2 = 2, 4, 50, 50
    pred2, target2, mask2 = _make_inputs(jax.random.PRNGKey(1), N2, C2, H2, W2)
    loss2 = jax.block_until_ready(
        mla_cw_loss(pred2, target2, mask2, input_budget_bytes=64 * 1024))
    ref2 = jax.block_until_ready(_ref_loss(pred2, target2, mask2))
    assert jnp.isfinite(loss2), "non-finite loss (tiled case)"
    assert jnp.allclose(loss2, ref2, rtol=1e-4, atol=1e-4), (loss2, ref2)

    # --- narrow-dtype contract (v5e HBM-bound path): bf16 inputs, kernel
    #     upcasts internally; reference computed on the same quantized values.
    pred3 = pred.astype(jnp.bfloat16)
    target3 = target.astype(jnp.bfloat16)
    mask3 = mask.astype(jnp.bfloat16)
    loss3 = jax.block_until_ready(mla_cw_loss(pred3, target3, mask3))
    ref3 = jax.block_until_ready(_ref_loss(pred3.astype(jnp.float32),
                                           target3.astype(jnp.float32),
                                           mask3.astype(jnp.float32)))
    assert jnp.isfinite(loss3), "non-finite loss (bf16 case)"
    assert jnp.allclose(loss3, ref3, rtol=3e-2, atol=3e-2), (loss3, ref3)

    print("KERNEL_OK")
</pallas_src>

<mosaic_0001>
module attributes {stable_mosaic.version = 11 : i64} {
  func.func @_acw_reduce_kernel(%arg0: i32, %arg1: i32, %arg2: i32, %arg3: memref<1x4x2x128xf32, #tpu.memory_space<vmem>>, %arg4: memref<1x4x2x128xf32, #tpu.memory_space<vmem>>, %arg5: memref<1x2x128xf32, #tpu.memory_space<vmem>>, %arg6: memref<1x4x4x128xf32, #tpu.memory_space<vmem>>) attributes {dimension_semantics = [#tpu.dimension_semantics<parallel>, #tpu.dimension_semantics<parallel>, #tpu.dimension_semantics<arbitrary>], iteration_bounds = array<i64: 1, 2, 1>, scalar_prefetch = 0 : i64, scratch_operands = 0 : i64, tpu.core_type = #tpu.core_type<tc>, window_params = [{transform_indices = @transform_0, window_bounds = array<i64: 1, 4, 2, 128>}, {transform_indices = @transform_1, window_bounds = array<i64: 1, 4, 2, 128>}, {transform_indices = @transform_2, window_bounds = array<i64: 1, 2, 128>}, {transform_indices = @transform_3, window_bounds = array<i64: 1, 4, 4, 128>}]} {
    %c0_i32 = arith.constant 0 : i32
    %0 = arith.cmpi eq, %arg2, %c0_i32 : i32
    %1 = arith.extui %0 : i1 to i32
    %c0_i32_0 = arith.constant 0 : i32
    %2 = arith.cmpi ne, %1, %c0_i32_0 : i32
    scf.if %2 {
      %cst_49 = arith.constant 0.000000e+00 : f32
      %64 = vector.broadcast %cst_49 : f32 to vector<1x4x4x128xf32>
      %c0_50 = arith.constant 0 : index
      %c0_51 = arith.constant 0 : index
      %c0_52 = arith.constant 0 : index
      %c0_53 = arith.constant 0 : index
      %65 = vector.load %arg6[%c0_50, %c0_51, %c0_52, %c0_53] : memref<1x4x4x128xf32, #tpu.memory_space<vmem>>, vector<1x4x4x128xf32>
      tpu.vector_store %arg6[%c0_50, %c0_51, %c0_52, %c0_53], %64 {strides = array<i32>} : memref<1x4x4x128xf32, #tpu.memory_space<vmem>>, vector<1x4x4x128xf32>,
    } else {
    }
    %c0 = arith.constant 0 : index
    %c0_1 = arith.constant 0 : index
    %c0_2 = arith.constant 0 : index
    %c0_3 = arith.constant 0 : index
    %3 = vector.load %arg3[%c0, %c0_1, %c0_2, %c0_3] : memref<1x4x2x128xf32, #tpu.memory_space<vmem>>, vector<1x4x2x128xf32>
    %4 = vector.shape_cast %3 : vector<1x4x2x128xf32> to vector<4x2x128xf32>
    %c0_4 = arith.constant 0 : index
    %c0_5 = arith.constant 0 : index
    %c0_6 = arith.constant 0 : index
    %c0_7 = arith.constant 0 : index
    %5 = vector.load %arg4[%c0_4, %c0_5, %c0_6, %c0_7] : memref<1x4x2x128xf32, #tpu.memory_space<vmem>>, vector<1x4x2x128xf32>
    %6 = vector.shape_cast %5 : vector<1x4x2x128xf32> to vector<4x2x128xf32>
    %c0_8 = arith.constant 0 : index
    %c0_9 = arith.constant 0 : index
    %c0_10 = arith.constant 0 : index
    %7 = vector.load %arg5[%c0_8, %c0_9, %c0_10] : memref<1x2x128xf32, #tpu.memory_space<vmem>>, vector<1x2x128xf32>
    %8 = vector.shape_cast %7 : vector<1x2x128xf32> to vector<2x128xf32>
    %9 = vector.shape_cast %8 : vector<2x128xf32> to vector<1x2x128xf32>
    %cst = arith.constant 5.000000e-01 : f32
    %10 = vector.broadcast %cst : f32 to vector<4x2x128xf32>
    %11 = arith.mulf %10, %4 : vector<4x2x128xf32>
    %12 = math.tanh %11 : vector<4x2x128xf32>
    %cst_11 = arith.constant 1.000000e+00 : f32
    %13 = vector.broadcast %cst_11 : f32 to vector<4x2x128xf32>
    %14 = arith.addf %12, %13 : vector<4x2x128xf32>
    %cst_12 = arith.constant 5.000000e-01 : f32
    %15 = vector.broadcast %cst_12 : f32 to vector<4x2x128xf32>
    %16 = arith.mulf %15, %14 : vector<4x2x128xf32>
    %17 = vector.broadcast %9 : vector<1x2x128xf32> to vector<4x2x128xf32>
    %18 = arith.mulf %6, %17 : vector<4x2x128xf32>
    %19 = vector.broadcast %9 : vector<1x2x128xf32> to vector<4x2x128xf32>
    %20 = arith.mulf %16, %19 : vector<4x2x128xf32>
    %21 = arith.subf %6, %16 : vector<4x2x128xf32>
    %22 = arith.mulf %21, %21 : vector<4x2x128xf32>
    %cst_13 = arith.constant 1.00000012 : f32
    %23 = vector.broadcast %cst_13 : f32 to vector<4x2x128xf32>
    %24 = arith.subf %23, %22 : vector<4x2x128xf32>
    %25 = math.log %24 : vector<4x2x128xf32>
    %26 = arith.subf %22, %25 : vector<4x2x128xf32>
    %cst_14 = arith.constant 1.00000012 : f32
    %27 = vector.broadcast %cst_14 : f32 to vector<4x2x128xf32>
    %28 = arith.addf %27, %22 : vector<4x2x128xf32>
    %29 = math.log %28 : vector<4x2x128xf32>
    %30 = arith.addf %26, %29 : vector<4x2x128xf32>
    %31 = arith.addf %16, %6 : vector<4x2x128xf32>
    %cst_15 = arith.constant 1.000000e+00 : f32
    %32 = vector.broadcast %cst_15 : f32 to vector<4x2x128xf32>
    %33 = arith.addf %32, %31 : vector<4x2x128xf32>
    %34 = arith.mulf %33, %30 : vector<4x2x128xf32>
    %c0_16 = arith.constant 0 : index
    %c0_17 = arith.constant 0 : index
    %c0_18 = arith.constant 0 : index
    %c0_19 = arith.constant 0 : index
    %35 = vector.load %arg6[%c0_16, %c0_17, %c0_18, %c0_19] : memref<1x4x4x128xf32, #tpu.memory_space<vmem>>, vector<1x1x4x128xf32>
    %36 = vector.shape_cast %35 : vector<1x1x4x128xf32> to vector<4x128xf32>
    %cst_20 = arith.constant dense<0.000000e+00> : vector<4x128xf32>
    %37 = vector.multi_reduction <add>, %18, %cst_20 [1] : vector<4x2x128xf32> to vector<4x128xf32>
    %38 = arith.addf %36, %37 : vector<4x128xf32>
    %c0_21 = arith.constant 0 : index
    %c0_22 = arith.constant 0 : index
    %c0_23 = arith.constant 0 : index
    %c0_24 = arith.constant 0 : index
    %39 = vector.load %arg6[%c0_21, %c0_22, %c0_23, %c0_24] : memref<1x4x4x128xf32, #tpu.memory_space<vmem>>, vector<1x1x4x128xf32>
    %40 = vector.shape_cast %39 : vector<1x1x4x128xf32> to vector<4x128xf32>
    %41 = vector.shape_cast %38 : vector<4x128xf32> to vector<1x1x4x128xf32>
    tpu.vector_store %arg6[%c0_21, %c0_22, %c0_23, %c0_24], %41 {strides = array<i32>} : memref<1x4x4x128xf32, #tpu.memory_space<vmem>>, vector<1x1x4x128xf32>,
    %c0_25 = arith.constant 0 : index
    %c1 = arith.constant 1 : index
    %c0_26 = arith.constant 0 : index
    %c0_27 = arith.constant 0 : index
    %42 = vector.load %arg6[%c0_25, %c1, %c0_26, %c0_27] : memref<1x4x4x128xf32, #tpu.memory_space<vmem>>, vector<1x1x4x128xf32>
    %43 = vector.shape_cast %42 : vector<1x1x4x128xf32> to vector<4x128xf32>
    %44 = arith.mulf %16, %18 : vector<4x2x128xf32>
    %cst_28 = arith.constant dense<0.000000e+00> : vector<4x128xf32>
    %45 = vector.multi_reduction <add>, %44, %cst_28 [1] : vector<4x2x128xf32> to vector<4x128xf32>
    %46 = arith.addf %43, %45 : vector<4x128xf32>
    %c0_29 = arith.constant 0 : index
    %c1_30 = arith.constant 1 : index
    %c0_31 = arith.constant 0 : index
    %c0_32 = arith.constant 0 : index
    %47 = vector.load %arg6[%c0_29, %c1_30, %c0_31, %c0_32] : memref<1x4x4x128xf32, #tpu.memory_space<vmem>>, vector<1x1x4x128xf32>
    %48 = vector.shape_cast %47 : vector<1x1x4x128xf32> to vector<4x128xf32>
    %49 = vector.shape_cast %46 : vector<4x128xf32> to vector<1x1x4x128xf32>
    tpu.vector_store %arg6[%c0_29, %c1_30, %c0_31, %c0_32], %49 {strides = array<i32>} : memref<1x4x4x128xf32, #tpu.memory_space<vmem>>, vector<1x1x4x128xf32>,
    %c0_33 = arith.constant 0 : index
    %c2 = arith.constant 2 : index
    %c0_34 = arith.constant 0 : index
    %c0_35 = arith.constant 0 : index
    %50 = vector.load %arg6[%c0_33, %c2, %c0_34, %c0_35] : memref<1x4x4x128xf32, #tpu.memory_space<vmem>>, vector<1x1x4x128xf32>
    %51 = vector.shape_cast %50 : vector<1x1x4x128xf32> to vector<4x128xf32>
    %cst_36 = arith.constant dense<0.000000e+00> : vector<4x128xf32>
    %52 = vector.multi_reduction <add>, %20, %cst_36 [1] : vector<4x2x128xf32> to vector<4x128xf32>
    %53 = arith.addf %51, %52 : vector<4x128xf32>
    %c0_37 = arith.constant 0 : index
    %c2_38 = arith.constant 2 : index
    %c0_39 = arith.constant 0 : index
    %c0_40 = arith.constant 0 : index
    %54 = vector.load %arg6[%c0_37, %c2_38, %c0_39, %c0_40] : memref<1x4x4x128xf32, #tpu.memory_space<vmem>>, vector<1x1x4x128xf32>
    %55 = vector.shape_cast %54 : vector<1x1x4x128xf32> to vector<4x128xf32>
    %56 = vector.shape_cast %53 : vector<4x128xf32> to vector<1x1x4x128xf32>
    tpu.vector_store %arg6[%c0_37, %c2_38, %c0_39, %c0_40], %56 {strides = array<i32>} : memref<1x4x4x128xf32, #tpu.memory_space<vmem>>, vector<1x1x4x128xf32>,
    %c0_41 = arith.constant 0 : index
    %c3 = arith.constant 3 : index
    %c0_42 = arith.constant 0 : index
    %c0_43 = arith.constant 0 : index
    %57 = vector.load %arg6[%c0_41, %c3, %c0_42, %c0_43] : memref<1x4x4x128xf32, #tpu.memory_space<vmem>>, vector<1x1x4x128xf32>
    %58 = vector.shape_cast %57 : vector<1x1x4x128xf32> to vector<4x128xf32>
    %cst_44 = arith.constant dense<0.000000e+00> : vector<4x128xf32>
    %59 = vector.multi_reduction <add>, %34, %cst_44 [1] : vector<4x2x128xf32> to vector<4x128xf32>
    %60 = arith.addf %58, %59 : vector<4x128xf32>
    %c0_45 = arith.constant 0 : index
    %c3_46 = arith.constant 3 : index
    %c0_47 = arith.constant 0 : index
    %c0_48 = arith.constant 0 : index
    %61 = vector.load %arg6[%c0_45, %c3_46, %c0_47, %c0_48] : memref<1x4x4x128xf32, #tpu.memory_space<vmem>>, vector<1x1x4x128xf32>
    %62 = vector.shape_cast %61 : vector<1x1x4x128xf32> to vector<4x128xf32>
    %63 = vector.shape_cast %60 : vector<4x128xf32> to vector<1x1x4x128xf32>
    tpu.vector_store %arg6[%c0_45, %c3_46, %c0_47, %c0_48], %63 {strides = array<i32>} : memref<1x4x4x128xf32, #tpu.memory_space<vmem>>, vector<1x1x4x128xf32>,
    return
  }
  func.func @transform_0(%arg0: i32, %arg1: i32, %arg2: i32) -> (i32, i32, i32, i32) {
    %c1_i32 = arith.constant 1 : i32
    %0 = arith.muli %arg0, %c1_i32 : i32
    %1 = arith.addi %0, %arg2 : i32
    %c0_i32 = arith.constant 0 : i32
    %c0_i32_0 = arith.constant 0 : i32
    %c0_i32_1 = arith.constant 0 : i32
    return %arg1, %c0_i32, %1, %c0_i32_0 : i32, i32, i32, i32
  }
  func.func @transform_1(%arg0: i32, %arg1: i32, %arg2: i32) -> (i32, i32, i32, i32) {
    %c1_i32 = arith.constant 1 : i32
    %0 = arith.muli %arg0, %c1_i32 : i32
    %1 = arith.addi %0, %arg2 : i32
    %c0_i32 = arith.constant 0 : i32
    %c0_i32_0 = arith.constant 0 : i32
    %c0_i32_1 = arith.constant 0 : i32
    return %arg1, %c0_i32, %1, %c0_i32_0 : i32, i32, i32, i32
  }
  func.func @transform_2(%arg0: i32, %arg1: i32, %arg2: i32) -> (i32, i32, i32) {
    %c1_i32 = arith.constant 1 : i32
    %0 = arith.muli %arg0, %c1_i32 : i32
    %1 = arith.addi %0, %arg2 : i32
    %c0_i32 = arith.constant 0 : i32
    %c0_i32_0 = arith.constant 0 : i32
    return %arg1, %1, %c0_i32 : i32, i32, i32
  }
  func.func @transform_3(%arg0: i32, %arg1: i32, %arg2: i32) -> (i32, i32, i32, i32) {
    %c2_i32 = arith.constant 2 : i32
    %0 = arith.muli %arg0, %c2_i32 : i32
    %1 = arith.addi %0, %arg1 : i32
    %c0_i32 = arith.constant 0 : i32
    %c0_i32_0 = arith.constant 0 : i32
    %c0_i32_1 = arith.constant 0 : i32
    %c0_i32_2 = arith.constant 0 : i32
    return %1, %c0_i32, %c0_i32_0, %c0_i32_1 : i32, i32, i32, i32
  }
}

</mosaic_0001>

<bundles_post_ra>
// kernel: tpu_custom_call.1
= control target key start
LH: loop header
LB: loop body
LE: loop exit
PB: predicated region body
PF: predicated region fallthrough
CT: control target
= control target key end

     0   :  { %8 = vsyncpa [#allocation3], 0  ;;  %s1369_s0 = inlined_call_operand.hbm [shape: f32[2,4,2,128], index: 0, kind: input, shape index: {}]   ;;  %s1370_s1 = inlined_call_operand.hbm [shape: f32[2,4,2,128], index: 1, kind: input, shape index: {}]   ;;  %s1371_s2 = inlined_call_operand.vmem [shape: f32[2,2,128], index: 2, kind: input, shape index: {}]   ;;  %s1372_s3 = inlined_call_operand.hbm [shape: f32[2,4,4,128], index: 3, kind: output, shape index: {}]  }
   0x1   :  { %10 = vsyncpa [#allocation3 + $0x1], 0 }
   0x2   :  { %11 = vsyncpa [#allocation6], 0 }
   0x3   :  { %13 = vsyncpa [#allocation6 + $0x1], 0 }
   0x4   :  { %14 = vsyncpa [#allocation4], 0 }
   0x5   :  { %16 = vsyncpa [#allocation4 + $0x1], 0  ;;  %s1010_s12 = smov 0   ;;  %s1012_s13 = smov 0  }
   0x6   :  { %s1014_s14 = smov 0   ;;  %s1016_s15 = smov 0  }
   0x7   :  { %s1018_s16 = smov 0   ;;  %s1020_s17 = smov 0  }
   0x8 LB: > { %s709_s18 = sadd.s32 4294967295, %s980_s17   ;;  %s710_s19 = sadd.s32 4294967294, %s980_s17   ;;  %s980_s17 = sphi %s1020_s17, %s22_s17   ;;  %s976_s16 = sphi %s1018_s16, %s1390_s16   ;;  %s972_s15 = sphi %s1016_s15, %s1389_s15   ;;  %s968_s14 = sphi %s1014_s14, %s1388_s14   ;;  %s964_s13 = sphi %s1012_s13, %s1387_s13   ;;  %s960_s12 = sphi %s1010_s12, %s1386_s12  }
   0x9   : > { %s37_s20 = sadd.s32 1, %s976_s16  ;;  %s52_s21 = sadd.s32 1, %s968_s14 }
   0xa   : > { %p39_p0 = scmp.ge.s32.totalorder %s37_s20, 2  ;;  %p59_p1 = scmp.ne.s32.totalorder %s968_s14, %s964_s13 }
   0xb   : > { %p60_p2 = scmp.eq.s32.totalorder %s980_s17, 0  ;;  %p65_p3 = scmp.ne.s32.totalorder %s964_s13, %s960_s12 }
   0xc   : > { %s1392_s20 = smov (%p39_p0, %s37_s20), 0  ;;  %p66_p5 = scmp.eq.s32.totalorder %s709_s18, 0 }
   0xd   : > { %p1051_p4 = por %p60_p2, %p59_p1  ;;  %s47_s23 = ssub.s32 %s976_s16, %s1392_s20 }
   0xe   : > { %p153_p6 = scmp.eq.s32.totalorder %s709_s18, 1  ;;  %p50_p7 = scmp.eq.s32.totalorder %s47_s23, 0 }
   0xf   : > { %p1057_p8 = por %p66_p5, %p65_p3  ;;  %p159_p10 = scmp.eq.s32.totalorder %s710_s19, 1 }
  0x10   : > { %p1061_p9 = por %p153_p6, %p59_p1  ;;  %p755_p13 = scmp.lt.s32.totalorder %s980_s17, 2 }
  0x11   : > { %s1376_s24 = scalar_select %p1057_p8, 1, 0 }
  0x12   : > { %s1377_s25 = scalar_select %p1061_p9, 1, 0 }
  0x13   : > { %s1066_s26 = scalar_select %p50_p7, %s968_s14, %s52_s21  }
  0x14   : > { %p1068_p11 = por %p159_p10, %p65_p3  ;;  %s1075_s28 = sand.u32 1, %s968_s14  }
  0x15   : > { %s713_s29 = sshll.u32 %s1075_s28, 3  ;;  %s735_s30 = sshll.u32 %s976_s16, 7 }
  0x16   : > { %s1378_s27 = scalar_select %p1068_p11, 1, 0 }
  0x17   : > { %s1084_s6 = scalar_lea.hbm %s1369_s0, %s735_s30  ;;  %s183_s7 = scalar_lea.vmem [#allocation2], %s713_s29 }
  0x18   : > { %s192_s8 = sshll.u32 %s183_s7, 4  ;;  %p1092_p0 = pnand %p755_p13, %p1051_p4  ;;  %s1088_s8 = int_to_ptr.vmem [resolvable:$true] %s192_s8 }
  0x19   : > { %s180_s10 = scalar_lea.sflag [#allocation3], %s1075_s28  ;;  %s834_s11 = scalar_lea.hbm %s1084_s6, 128 }
  0x1a   : > { %p835_p2 = scmp.ne.s32.totalorder %s1084_s6, %s834_s11  ;;  %p836_p3 = pneg %p1092_p0 }
  0x1b   : > { %s839_s21 = scalar_lea.hbm %s1369_s0, 256  ;;  %p840_p4 = scmp.lt.u32.totalorder %s1084_s6, %s1369_s0 }
  0x1c   : > { %p837_p5 = pnand %p836_p3, %p835_p2  ;;  %p841_p7 = scmp.lt.u32.totalorder %s839_s21, %s834_s11 }
  0x1d   : > { %p843_p13 = scmp.lt.u32.totalorder %s834_s11, %s1084_s6 }
  0x1e   : > { %p838_p6 = pneg %p837_p5  ;;  %p842_p10 = por %p841_p7, %p840_p4 }
  0x20   : > { %p844_p12 = por %p843_p13, %p842_p10 }
  0x22   : > { %p845_p1 = pnand %p844_p12, %p838_p6 }
  0x24   : > { %848 = shalt.err (!%p845_p1)
}
  0x25   : > { %s849_s4 = scalar_lea.vmem %s1088_s8, 128  ;;  %s982_s5 = smov [#allocation2]  }
  0x26   : > { %p850_p2 = scmp.ne.s32.totalorder %s1088_s8, %s849_s4  ;;  %s854_s7 = sshll.u32 %s982_s5, 4  ;;  %s855_s7 = int_to_ptr.vmem [resolvable:$false] %s854_s7 }
  0x27   : > { %s856_s18 = scalar_lea.vmem %s855_s7, 256  ;;  %p857_p9 = scmp.lt.s32.totalorder %s1088_s8, %s855_s7 }
  0x28   : > { %p852_p5 = pnand %p850_p2, %p836_p3  ;;  %p858_p4 = scmp.lt.s32.totalorder %s856_s18, %s849_s4 }
  0x2a   : > { %p853_p11 = pneg %p852_p5  ;;  %p859_p7 = por %p858_p4, %p857_p9 }
  0x2c   : > { %p860_p10 = pnand %p859_p7, %p853_p11 }
  0x2e   : > { %863 = shalt.err (!%p860_p10)
}
  0x2f   : > { %s983_s11 = smov 32   ;;  %s984_s19 = smov 2  }
  0x30   : > { %747 = dma.hbm_to_vmem [thread:$0]  (!%p1092_p0), %s1084_s6, 128, %s1088_s8, %s180_s10, %s983_s11, %s983_s11, %s984_s19  }
  0x31   : > { %p235_p9 = scmp.lt.s32.totalorder %s980_s17, 3  ;;  %s1134_s23 = scalar_lea.hbm %s1370_s1, %s735_s30 }
  0x32   : > { %p1380_p11 = scmp.ge.s32.totalorder %s980_s17, 1  ;;  %s206_s5 = scalar_lea.vmem [#allocation5], %s713_s29 }
  0x33   : > { %s215_s7 = sshll.u32 %s206_s5, 4  ;;  %s203_s6 = scalar_lea.sflag [#allocation6], %s1075_s28  ;;  %s1144_s7 = int_to_ptr.vmem [resolvable:$true] %s215_s7 }
  0x34   : > { %p1138_p12 = pnand %p1380_p11, %p235_p9  ;;  %s864_s8 = scalar_lea.hbm %s1134_s23, 128 }
  0x35   : > { %p865_p1 = scmp.ne.s32.totalorder %s1134_s23, %s864_s8  ;;  %s869_s18 = scalar_lea.hbm %s1370_s1, 256 }
  0x36   : > { %p870_p2 = scmp.lt.u32.totalorder %s1134_s23, %s1370_s1  ;;  %p871_p5 = scmp.lt.u32.totalorder %s869_s18, %s864_s8 }
  0x37   : > { %p867_p6 = pnand %p865_p1, %p836_p3  ;;  %p873_p7 = scmp.lt.u32.totalorder %s864_s8, %s1134_s23 }
  0x38   : > { %p872_p4 = por %p871_p5, %p870_p2 }
  0x39   : > { %p868_p13 = pneg %p867_p6 }
  0x3a   : > { %p874_p10 = por %p873_p7, %p872_p4 }
  0x3c   : > { %p875_p9 = pnand %p874_p10, %p868_p13 }
  0x3e   : > { %878 = shalt.err (!%p875_p9)
}
  0x3f   : > { %s879_s29 = scalar_lea.vmem %s1144_s7, 128  ;;  %s985_s5 = smov [#allocation5]  }
  0x40   : > { %p880_p11 = scmp.ne.s32.totalorder %s1144_s7, %s879_s29  ;;  %s884_s30 = sshll.u32 %s985_s5, 4  ;;  %s885_s30 = int_to_ptr.vmem [resolvable:$false] %s884_s30 }
  0x41   : > { %s886_s10 = scalar_lea.vmem %s885_s30, 256  ;;  %p887_p8 = scmp.lt.s32.totalorder %s1144_s7, %s885_s30 }
  0x42   : > { %p882_p1 = pnand %p880_p11, %p836_p3  ;;  %p888_p2 = scmp.lt.s32.totalorder %s886_s10, %s879_s29 }
  0x44   : > { %p883_p6 = pneg %p882_p1  ;;  %p889_p5 = por %p888_p2, %p887_p8 }
  0x46   : > { %p890_p4 = pnand %p889_p5, %p883_p6 }
  0x48   : > { %893 = shalt.err (!%p890_p4)
}
  0x49   : > { %750 = dma.hbm_to_vmem [thread:$0]  (!%p1092_p0), %s1134_s23, 128, %s1144_s7, %s203_s6, %s983_s11, %s983_s11, %s984_s19  }
  0x4a   : > { %239 = sbr.rel (%p1138_p12) target bundleno = 181 (0xb5), region = 32  ;;  %s1178_s8 = sand.u32 (!%p1138_p12), 1, %s964_s13  }
  0x4b   : > { %s720_s18 = sshll.u32 (!%p1138_p12), %s1178_s8, 3  ;;  %s242_s21 = scalar_lea.sflag (!%p1138_p12), [#allocation3], %s1178_s8 }
  0x4c   : > { %s245_s9 = scalar_lea.vmem (!%p1138_p12), [#allocation2], %s720_s18  ;;  %p1382_p8 = scmp.ne.s32.totalorder (!%p1138_p12), %s1376_s24, 0 }
  0x51   : > { %947 = dma.done.wait (%p1382_p8), %s242_s21, 128  }
  0x52   : > { %949 = vsyncadd (%p1382_p8), %s242_s21, 4294967168  ;;  %s251_s28 = scalar_lea.sflag [#allocation6], %s1178_s8  ;;  %s254_s11 = scalar_lea.vmem [#allocation5], %s720_s18 }
  0x53   : > { %951 = dma.done.wait (%p1382_p8), %s251_s28, 128  }
  0x54   : > { %953 = vsyncadd (%p1382_p8), %s251_s28, 4294967168  ;;  %s722_s19 = sshll.u32 %s1178_s8, 4  ;;  %p293_p0 = scmp.lt.s32.totalorder %s972_s15, 1  ;;  %v986_v0 = vmov 0.0   ;;  %v311_v1 = vld [vmem:[%s245_s9] sm:$0x3] }
  0x55   : > { %s1193_s23 = scalar_lea.vmem [#allocation7], %s722_s19  ;;  %v312_v2 = vld [vmem:[%s245_s9 + $0x2] sm:$0x3]  ;;  %v313_v3 = vld [vmem:[%s245_s9 + $0x4] sm:$0x3]  ;;  %v320_v9 = vmul.f32 0.5, %v311_v1 }
  0x56   : > { %307 = vst [vmem:[%s1193_s23] sm:$0xf] %v986_v0  ;;  %308 = vst [vmem:[%s1193_s23 + $0x4] sm:$0xf] %v986_v0  ;;  %s294_s4 = scalar_select %p293_p0, %s972_s15, 1  ;;  %v314_v4 = vld [vmem:[%s245_s9 + $0x6] sm:$0x3] }
  0x57   : > { %309 = vst [vmem:[%s1193_s23 + $0x8] sm:$0xf] %v986_v0  ;;  %310 = vst [vmem:[%s1193_s23 + $0xc] sm:$0xf] %v986_v0  ;;  %v1203_v5 = vld [vmem:[%s254_s11] sm:$0x3]  ;;  %810 = vtanh.f32 %v320_v9 }
  0x58   : > { %s723_s7 = sshll.u32 %s294_s4, 1  ;;  %v1205_v6 = vld [vmem:[%s254_s11 + $0x2] sm:$0x3]  ;;  %v1209_v8 = vld [vmem:[%s254_s11 + $0x4] sm:$0x3]  ;;  %v321_v10 = vmul.f32 0.5, %v312_v2 }
  0x59   : > { %s299_s22 = scalar_lea.vmem %s1371_s2, %s723_s7  ;;  %v322_v11 = vmul.f32 0.5, %v313_v3  ;;  %vm397_vm0 = vcmask 1041408   ;;  %v1211_v12 = vld [vmem:[%s254_s11 + $0x6] sm:$0x3]  ;;  %v323_v13 = vmul.f32 0.5, %v314_v4  ;;  %vm430_vm1 = vcmask 1041409  }
  0x5a   : > { %v1207_v7 = vld [vmem:[%s299_s22] sm:$0x3]  ;;  %812 = vtanh.f32 %v321_v10  ;;  %vm432_vm2 = vcmask 1042434   ;;  %vm434_vm3 = vcmask 1043459   ;;  %s737_s29 = sshll.u32 %s972_s15, 8  ;;  %s579_s5 = sshll.u32 %s1193_s23, 4  ;;  %s1319_s5 = int_to_ptr.vmem [resolvable:$true] %s579_s5 }
  0x5b   : > { %v336_v14 = vmul.f32 %v1207_v7, %v1203_v5  ;;  %v337_v15 = vmul.f32 %v1207_v7, %v1205_v6  ;;  %v338_v16 = vmul.f32 %v1207_v7, %v1209_v8  ;;  %v339_v17 = vmul.f32 %v1207_v7, %v1211_v12  ;;  %s1317_s18 = scalar_lea.hbm %s1372_s3, %s737_s29  ;;  %s564_s15 = scalar_lea.sflag [#allocation4], %s1178_s8 }
  0x5c   : > { %814 = vtanh.f32 %v322_v11  ;;  %s894_s21 = scalar_lea.vmem %s1319_s5, 256  ;;  %p1383_p12 = scmp.ne.s32.totalorder %s1377_s25, 0 }
  0x5d   : > { %v398_v18 = vsel %vm397_vm0, %v336_v14, 0.0  ;;  %v405_v19 = vsel %vm397_vm0, %v337_v15, 0.0  ;;  %v412_v20 = vsel %vm397_vm0, %v338_v16, 0.0  ;;  %816 = vtanh.f32 %v323_v13  ;;  %v396_v58 = vld [vmem:[%s1193_s23] sm:$0xf]  ;;  %p895_p3 = scmp.ne.s32.totalorder %s1319_s5, %s894_s21  ;;  %s987_s9 = smov [#allocation7]  }
  0x5e   : > { %v399_v21 = vrot.slane %v398_v18, 4  ;;  %v406_v22 = vrot.slane %v405_v19, 4  ;;  %v413_v23 = vrot.slane %v412_v20, 4  ;;  %v419_v24 = vsel %vm397_vm0, %v339_v17, 0.0  ;;  %s898_s28 = sshll.u32 %s987_s9, 4  ;;  %s899_s28 = int_to_ptr.vmem [resolvable:$false] %s898_s28 }
  0x5f   : > { %v420_v28 = vrot.slane %v419_v24, 4  ;;  %p896_p13 = pnand %p895_p3, %p1383_p12  ;;  %s900_s11 = scalar_lea.vmem %s899_s28, 512 }
  0x60   : > { %v400_v25 = vadd.f32 %v399_v21, %v398_v18  ;;  %v407_v26 = vadd.f32 %v406_v22, %v405_v19  ;;  %v414_v27 = vadd.f32 %v413_v23, %v412_v20  ;;  %p901_p10 = scmp.lt.s32.totalorder %s1319_s5, %s899_s28  ;;  %p902_p9 = scmp.lt.s32.totalorder %s900_s11, %s894_s21 }
  0x61   : > { %v421_v32 = vadd.f32 %v420_v28, %v419_v24  ;;  %v811_v37 = vpop.eup %810  ;;  %p897_p7 = pneg %p896_p13 }
  0x62   : > { %v401_v29 = vrot.slane %v400_v25, 2  ;;  %v408_v30 = vrot.slane %v407_v26, 2  ;;  %v415_v31 = vrot.slane %v414_v27, 2  ;;  %v328_v43 = vadd.f32 1.0, %v811_v37  ;;  %p903_p11 = por %p902_p9, %p901_p10 }
  0x63   : > { %v422_v36 = vrot.slane %v421_v32, 2 }
  0x64   : > { %v402_v33 = vadd.f32 %v401_v29, %v400_v25  ;;  %v409_v34 = vadd.f32 %v408_v30, %v407_v26  ;;  %v416_v35 = vadd.f32 %v415_v31, %v414_v27  ;;  %v813_v42 = vpop.eup %812  ;;  %v1225_v51 = vmul.f32 0.5, %v328_v43  ;;  %p904_p1 = pnand %p903_p11, %p897_p7 }
  0x65   : > { %v423_v41 = vadd.f32 %v422_v36, %v421_v32  ;;  %v329_v45 = vadd.f32 1.0, %v813_v42 }
  0x66   : > { %v403_v38 = vrot.slane %v402_v33, 1  ;;  %v410_v39 = vrot.slane %v409_v34, 1  ;;  %v417_v40 = vrot.slane %v416_v35, 1  ;;  %v815_v44 = vpop.eup %814  ;;  %v344_v57 = vsub.f32 %v1203_v5, %v1225_v51 }
  0x67   : > { %v817_v49 = vpop.eup %816  ;;  %v330_v50 = vadd.f32 1.0, %v815_v44  ;;  %v424_v52 = vrot.slane %v423_v41, 1  ;;  %v1227_v54 = vmul.f32 0.5, %v329_v45  ;;  %v441_v63 = vmul.f32 %v336_v14, %v1225_v51 }
  0x68   : > { %v404_v46 = vadd.f32 %v403_v38, %v402_v33  ;;  %v411_v47 = vadd.f32 %v410_v39, %v409_v34  ;;  %v418_v48 = vadd.f32 %v417_v40, %v416_v35  ;;  %v331_v53 = vadd.f32 1.0, %v817_v49 }
  0x69   : > { %v1230_v56 = vmul.f32 0.5, %v330_v50  ;;  %v425_v59 = vadd.f32 %v424_v52, %v423_v41  ;;  %v345_v62 = vsub.f32 %v1205_v6, %v1227_v54  ;;  %v442_v0 = vmul.f32 %v337_v15, %v1227_v54 }
  0x6a   : > { %v431_v55 = vsel %vm430_vm1, %v411_v47, %v404_v46  ;;  %v1236_v61 = vmul.f32 0.5, %v331_v53  ;;  %v1244_v2 = vmul.f32 %v344_v57, %v344_v57  ;;  %v445_v15 = vsel %vm397_vm0, %v441_v63, 0.0 }
  0x6b   : > { %v433_v60 = vsel %vm432_vm2, %v418_v48, %v431_v55  ;;  %v346_v1 = vsub.f32 %v1209_v8, %v1230_v56  ;;  %v443_v4 = vmul.f32 %v338_v16, %v1230_v56  ;;  %v1250_v10 = vmul.f32 %v345_v62, %v345_v62 }
  0x6c   : > { %v435_v3 = vsel %vm434_vm3, %v425_v59, %v433_v60  ;;  %v347_v9 = vsub.f32 %v1211_v12, %v1236_v61  ;;  %v444_v13 = vmul.f32 %v339_v17, %v1236_v61  ;;  %v452_v18 = vsel %vm397_vm0, %v442_v0, 0.0 }
  0x6d   : > { %v437_v11 = vadd.f32 %v435_v3, %v396_v58  ;;  %v1253_v14 = vmul.f32 %v346_v1, %v346_v1  ;;  %v459_v19 = vsel %vm397_vm0, %v443_v4, 0.0  ;;  %v446_v16 = vrot.slane %v445_v15, 4 }
  0x6e   : > { %v1258_v20 = vmul.f32 %v347_v9, %v347_v9  ;;  %v453_v21 = vrot.slane %v452_v18, 4  ;;  %v460_v22 = vrot.slane %v459_v19, 4  ;;  %v466_v23 = vsel %vm397_vm0, %v444_v13, 0.0 }
  0x6f   : > { %438 = vst [vmem:[%s1193_s23] sm:$0xf] %v437_v11  ;;  %v340_v24 = vmul.f32 %v1225_v51, %v1207_v7  ;;  %v341_v17 = vmul.f32 %v1227_v54, %v1207_v7  ;;  %v342_v25 = vmul.f32 %v1230_v56, %v1207_v7  ;;  %v447_v26 = vadd.f32 %v446_v16, %v445_v15  ;;  %v724_v11 = vld [vmem:[%s1193_s23 + $0x4] sm:$0xf] }
  0x70   : > { %v454_v27 = vadd.f32 %v453_v21, %v452_v18  ;;  %v461_v28 = vadd.f32 %v460_v22, %v459_v19  ;;  %v467_v29 = vrot.slane %v466_v23, 4  ;;  %v343_v30 = vmul.f32 %v1236_v61, %v1207_v7 }
  0x71   : > { %v485_v31 = vsel %vm397_vm0, %v340_v24, 0.0  ;;  %v492_v32 = vsel %vm397_vm0, %v341_v17, 0.0  ;;  %v499_v33 = vsel %vm397_vm0, %v342_v25, 0.0  ;;  %v448_v34 = vrot.slane %v447_v26, 2 }
  0x72   : > { %v455_v35 = vrot.slane %v454_v27, 2  ;;  %v462_v36 = vrot.slane %v461_v28, 2  ;;  %v468_v37 = vadd.f32 %v467_v29, %v466_v23  ;;  %v486_v38 = vrot.slane %v485_v31, 4 }
  0x73   : > { %v493_v39 = vrot.slane %v492_v32, 4  ;;  %v500_v40 = vrot.slane %v499_v33, 4  ;;  %v506_v41 = vsel %vm397_vm0, %v343_v30, 0.0  ;;  %v449_v42 = vadd.f32 %v448_v34, %v447_v26 }
  0x74   : > { %v456_v43 = vadd.f32 %v455_v35, %v454_v27  ;;  %v463_v44 = vadd.f32 %v462_v36, %v461_v28  ;;  %v469_v45 = vrot.slane %v468_v37, 2  ;;  %v487_v7 = vadd.f32 %v486_v38, %v485_v31  ;;  %v726_v35 = vld [vmem:[%s1193_s23 + $0x8] sm:$0xf] }
  0x75   : > { %v494_v46 = vadd.f32 %v493_v39, %v492_v32  ;;  %v501_v47 = vadd.f32 %v500_v40, %v499_v33  ;;  %v507_v48 = vrot.slane %v506_v41, 4  ;;  %v450_v49 = vrot.slane %v449_v42, 1 }
  0x76   : > { %v457_v50 = vrot.slane %v456_v43, 1  ;;  %v464_v52 = vrot.slane %v463_v44, 1  ;;  %v470_v53 = vadd.f32 %v469_v45, %v468_v37  ;;  %v488_v55 = vrot.slane %v487_v7, 2 }
  0x77   : > { %v495_v57 = vrot.slane %v494_v46, 2  ;;  %v502_v58 = vrot.slane %v501_v47, 2  ;;  %v508_v59 = vadd.f32 %v507_v48, %v506_v41  ;;  %v451_v60 = vadd.f32 %v450_v49, %v449_v42 }
  0x78   : > { %v458_v62 = vadd.f32 %v457_v50, %v456_v43  ;;  %v465_v63 = vadd.f32 %v464_v52, %v463_v44  ;;  %v471_v0 = vrot.slane %v470_v53, 1  ;;  %v489_v1 = vadd.f32 %v488_v55, %v487_v7 }
  0x79   : > { %v496_v3 = vadd.f32 %v495_v57, %v494_v46  ;;  %v503_v4 = vadd.f32 %v502_v58, %v501_v47  ;;  %v509_v9 = vrot.slane %v508_v59, 2  ;;  %v352_v18 = vsub.f32 1.0000001, %v1244_v2 }
  0x7a   : > { %v472_v13 = vadd.f32 %v471_v0, %v470_v53  ;;  %v477_v15 = vsel %vm430_vm1, %v458_v62, %v451_v60  ;;  %v353_v19 = vsub.f32 1.0000001, %v1250_v10  ;;  %v490_v21 = vrot.slane %v489_v1, 1 }
  0x7b   : > { %v478_v16 = vsel %vm432_vm2, %v465_v63, %v477_v15  ;;  %v497_v22 = vrot.slane %v496_v3, 1  ;;  %v504_v23 = vrot.slane %v503_v4, 1  ;;  %v510_v17 = vadd.f32 %v509_v9, %v508_v59 }
  0x7c   : > { %v479_v24 = vsel %vm434_vm3, %v472_v13, %v478_v16  ;;  %v354_v25 = vsub.f32 1.0000001, %v1253_v14  ;;  %v355_v26 = vsub.f32 1.0000001, %v1258_v20  ;;  %v491_v28 = vadd.f32 %v490_v21, %v489_v1 }
  0x7d   : > { %v481_v27 = vadd.f32 %v724_v11, %v479_v24  ;;  %v498_v29 = vadd.f32 %v497_v22, %v496_v3  ;;  %v505_v30 = vadd.f32 %v504_v23, %v503_v4  ;;  %v511_v31 = vrot.slane %v510_v17, 1 }
  0x7e   : > { %818 = vlog2.f32 %v352_v18  ;;  %v368_v32 = vadd.f32 1.0000001, %v1244_v2  ;;  %v369_v34 = vadd.f32 1.0000001, %v1250_v10  ;;  %v370_v38 = vadd.f32 1.0000001, %v1253_v14 }
  0x7f   : > { %725 = vst [vmem:[%s1193_s23 + $0x4] sm:$0xf] %v481_v27  ;;  %v517_v33 = vsel %vm430_vm1, %v498_v29, %v491_v28  ;;  %820 = vlog2.f32 %v353_v19  ;;  %v512_v36 = vadd.f32 %v511_v31, %v510_v17  ;;  %v371_v39 = vadd.f32 1.0000001, %v1258_v20 }
  0x80   : > { %v518_v37 = vsel %vm432_vm2, %v505_v30, %v517_v33  ;;  %822 = vlog2.f32 %v354_v25  ;;  %v384_v45 = vadd.f32 %v1225_v51, %v1203_v5  ;;  %v385_v47 = vadd.f32 %v1227_v54, %v1205_v6 }
  0x81   : > { %824 = vlog2.f32 %v355_v26  ;;  %v519_v40 = vsel %vm434_vm3, %v512_v36, %v518_v37  ;;  %v386_v52 = vadd.f32 %v1230_v56, %v1209_v8  ;;  %v387_v58 = vadd.f32 %v1236_v61, %v1211_v12 }
  0x82   : > { %826 = vlog2.f32 %v368_v32  ;;  %v521_v41 = vadd.f32 %v726_v35, %v519_v40  ;;  %v388_v60 = vadd.f32 1.0, %v384_v45 }
  0x83   : > { %828 = vlog2.f32 %v369_v34  ;;  %v390_v56 = vadd.f32 1.0, %v386_v52 }
  0x84   : > { %830 = vlog2.f32 %v370_v38  ;;  %727 = vst [vmem:[%s1193_s23 + $0x8] sm:$0xf] %v521_v41  ;;  %v728_v41 = vld [vmem:[%s1193_s23 + $0xc] sm:$0xf] }
  0x85   : > { %832 = vlog2.f32 %v371_v39 }
  0x88   : > { %v819_v42 = vpop.eup %818 }
  0x89   : > { %v821_v43 = vpop.eup %820  ;;  %v357_v44 = vmul.f32 0.6931472, %v819_v42 }
  0x8a   : > { %v823_v7 = vpop.eup %822  ;;  %v359_v46 = vmul.f32 0.6931472, %v821_v43 }
  0x8b   : > { %v825_v48 = vpop.eup %824  ;;  %v361_v49 = vmul.f32 0.6931472, %v823_v7  ;;  %v364_v50 = vsub.f32 %v1244_v2, %v357_v44  ;;  %v389_v2 = vadd.f32 1.0, %v385_v47 }
  0x8c   : > { %v827_v53 = vpop.eup %826  ;;  %v363_v55 = vmul.f32 0.6931472, %v825_v48  ;;  %v365_v57 = vsub.f32 %v1250_v10, %v359_v46  ;;  %v391_v10 = vadd.f32 1.0, %v387_v58 }
  0x8d   : > { %v829_v5 = vpop.eup %828  ;;  %v366_v51 = vsub.f32 %v1253_v14, %v361_v49  ;;  %v373_v59 = vmul.f32 0.6931472, %v827_v53 }
  0x8e   : > { %v831_v6 = vpop.eup %830  ;;  %v367_v54 = vsub.f32 %v1258_v20, %v363_v55  ;;  %v375_v62 = vmul.f32 0.6931472, %v829_v5 }
  0x8f   : > { %v833_v63 = vpop.eup %832  ;;  %v377_v0 = vmul.f32 0.6931472, %v831_v6  ;;  %v380_v8 = vadd.f32 %v373_v59, %v364_v50 }
  0x90   : > { %v379_v1 = vmul.f32 0.6931472, %v833_v63  ;;  %v381_v3 = vadd.f32 %v375_v62, %v365_v57 }
  0x91   : > { %v382_v4 = vadd.f32 %v377_v0, %v366_v51  ;;  %v392_v9 = vmul.f32 %v388_v60, %v380_v8 }
  0x92   : > { %v383_v12 = vadd.f32 %v379_v1, %v367_v54  ;;  %v393_v61 = vmul.f32 %v389_v2, %v381_v3 }
  0x93   : > { %v394_v11 = vmul.f32 %v390_v56, %v382_v4  ;;  %v525_v14 = vsel %vm397_vm0, %v392_v9, 0.0 }
  0x94   : > { %v395_v13 = vmul.f32 %v391_v10, %v383_v12  ;;  %v526_v15 = vrot.slane %v525_v14, 4  ;;  %v532_v20 = vsel %vm397_vm0, %v393_v61, 0.0 }
  0x95   : > { %v533_v18 = vrot.slane %v532_v20, 4  ;;  %v539_v19 = vsel %vm397_vm0, %v394_v11, 0.0 }
  0x96   : > { %v527_v16 = vadd.f32 %v526_v15, %v525_v14  ;;  %v540_v21 = vrot.slane %v539_v19, 4  ;;  %v546_v22 = vsel %vm397_vm0, %v395_v13, 0.0 }
  0x97   : > { %v534_v23 = vadd.f32 %v533_v18, %v532_v20  ;;  %v547_v24 = vrot.slane %v546_v22, 4 }
  0x98   : > { %v528_v17 = vrot.slane %v527_v16, 2  ;;  %v541_v25 = vadd.f32 %v540_v21, %v539_v19 }
  0x99   : > { %v535_v26 = vrot.slane %v534_v23, 2  ;;  %v548_v27 = vadd.f32 %v547_v24, %v546_v22 }
  0x9a   : > { %v529_v28 = vadd.f32 %v528_v17, %v527_v16  ;;  %v542_v29 = vrot.slane %v541_v25, 2 }
  0x9b   : > { %v536_v30 = vadd.f32 %v535_v26, %v534_v23  ;;  %v549_v31 = vrot.slane %v548_v27, 2 }
  0x9c   : > { %v530_v32 = vrot.slane %v529_v28, 1  ;;  %v543_v33 = vadd.f32 %v542_v29, %v541_v25 }
  0x9d   : > { %v537_v34 = vrot.slane %v536_v30, 1  ;;  %v550_v35 = vadd.f32 %v549_v31, %v548_v27 }
  0x9e   : > { %v531_v36 = vadd.f32 %v530_v32, %v529_v28  ;;  %v544_v37 = vrot.slane %v543_v33, 1 }
  0x9f   : > { %v538_v38 = vadd.f32 %v537_v34, %v536_v30  ;;  %v551_v39 = vrot.slane %v550_v35, 1 }
  0xa0   : > { %v545_v40 = vadd.f32 %v544_v37, %v543_v33 }
  0xa1   : > { %v552_v42 = vadd.f32 %v551_v39, %v550_v35  ;;  %v557_v43 = vsel %vm430_vm1, %v538_v38, %v531_v36 }
  0xa2   : > { %v558_v44 = vsel %vm432_vm2, %v545_v40, %v557_v43 }
  0xa3   : > { %v559_v45 = vsel %vm434_vm3, %v552_v42, %v558_v44 }
  0xa4   : > { %v561_v7 = vadd.f32 %v728_v41, %v559_v45 }
  0xa6   : > { %729 = vst [vmem:[%s1193_s23 + $0xc] sm:$0xf] %v561_v7 }
  0xa7   : > { %907 = shalt.err (!%p904_p1)
}
  0xa8   : > { %s908_s19 = scalar_lea.hbm %s1317_s18, 256  ;;  %s912_s7 = scalar_lea.hbm %s1372_s3, 512 }
  0xa9   : > { %p909_p6 = scmp.ne.s32.totalorder %s1317_s18, %s908_s19  ;;  %p913_p4 = scmp.lt.u32.totalorder %s1317_s18, %s1372_s3 }
  0xaa   : > { %p914_p8 = scmp.lt.u32.totalorder %s912_s7, %s908_s19  ;;  %p916_p3 = scmp.lt.u32.totalorder %s908_s19, %s1317_s18 }
  0xab   : > { %p910_p2 = pnand %p909_p6, %p1383_p12 }
  0xac   : > { %p915_p0 = por %p914_p8, %p913_p4 }
  0xad   : > { %p911_p5 = pneg %p910_p2 }
  0xae   : > { %p917_p13 = por %p916_p3, %p915_p0 }
  0xb0   : > { %p918_p7 = pnand %p917_p13, %p911_p5 }
  0xb2   : > { %921 = shalt.err (!%p918_p7)
}
  0xb3   : > { %s988_s22 = smov 64   ;;  %s989_s29 = smov 4  }
  0xb4   : > { %742 = dma.vmem_to_hbm [thread:$0]  (%p1383_p12), %s1319_s5, 256, %s1317_s18, %s564_s15, %s988_s22, %s988_s22, %s989_s29  }
  0xb5 PF: > { %s594_s30 = sand.u32 1, %s960_s12   ;;  %p1384_p10 = scmp.ne.s32.totalorder %s1378_s27, 0 }
  0xb6   : > { %p1385_p9 = scmp.ge.s32.totalorder %s980_s17, 2  ;;  %s595_s10 = scalar_lea.sflag [#allocation4], %s594_s30 }
  0xb8   : > { %p752_p11 = pnand %p1385_p9, %p1384_p10 }
  0xba   : > { %955 = dma.done.wait (!%p752_p11), %s595_s10, 256  }
  0xbb   : > { %957 = vsyncadd (!%p752_p11), %s595_s10, 4294967040  ;;  %s22_s17 = sadd.s32 1, %s980_s17   ;;  %s1386_s12 = smov %s964_s13 }
  0xbc   : > { %p19_p1 = scmp.ge.s32.totalorder %s22_s17, 4   ;;  %s1387_s13 = smov %s968_s14 }
  0xbd   : > { %s1388_s14 = smov %s1066_s26  ;;  %s1389_s15 = smov %s976_s16 }
  0xbe   : > { %s1390_s16 = smov %s1392_s20  ;;  %21 = sbr.rel (!%p19_p1) target bundleno = 8 (0x8), region = 100 }
  0xc5   :  { %600 = vsyncpa [#allocation3], 1 }
  0xc6   :  { %602 = vsyncpa [#allocation3 + $0x1], 1 }
  0xc7   :  { %603 = vsyncpa [#allocation6], 1 }
  0xc8   :  { %605 = vsyncpa [#allocation6 + $0x1], 1 }
  0xc9   :  { %606 = vsyncpa [#allocation4], 1 }
  0xca   :  { %608 = vsyncpa [#allocation4 + $0x1], 1 }

</bundles_post_ra>
